<compile_context>
chip_gen: v7x
topology: tpu7x:2x2x1
jax: 0.10.0
libtpu: 0.0.40
codegen_flags: <defaults>
</compile_context>

<pallas_src>
import functools

import jax
import jax.numpy as jnp
from jax.experimental import pallas as pl
from jax.experimental.pallas import tpu as pltpu

LN_EPS = 1e-5   # nn.LayerNorm default


def _round_up(x, m):
    return ((x + m - 1) // m) * m


def _bf16_transcendentals_supported():
    """bf16 VPU/EUP exists from TPU v6 onward; v5e and older convert to f32."""
    try:
        kind = jax.devices()[0].device_kind.lower()
    except Exception:
        return False
    return not any(tag in kind for tag in ("v2", "v3", "v4", "v5"))


def _actor_kernel(obs_ref,
                  w1_ref, b1_ref, g_ref, be_ref,
                  w2_ref, b2_ref,
                  w3_ref, b3_ref,
                  mu_ref, *, bf16_eup):
    # Linear 1: bf16 operands on the MXU, f32 accumulation.
    x = obs_ref[...].astype(jnp.bfloat16)
    h = jnp.dot(x, w1_ref[...], preferred_element_type=jnp.float32) + b1_ref[...]

    # LayerNorm (f32).  One-pass form: sum(x) and sum(x*x) are independent
    # cross-lane reductions, so they can overlap instead of the serial
    # mean -> center -> var chain.
    mean = jnp.mean(h, axis=-1, keepdims=True)
    mean_sq = jnp.mean(h * h, axis=-1, keepdims=True)
    var = jnp.maximum(mean_sq - mean * mean, 0.0)
    h = (h - mean) * jax.lax.rsqrt(var + LN_EPS) * g_ref[...] + be_ref[...]

    # Hidden-width tanh is the EUP-heavy op (hidden transcendentals/row).
    # bf16 tanh on v6e/v7x halves EUP + cast traffic; f32 path on v5e.
    if bf16_eup:
        h = jnp.tanh(h.astype(jnp.bfloat16))
    else:
        h = jnp.tanh(h).astype(jnp.bfloat16)

    # Linear 2 + ReLU.
    h = jnp.dot(h, w2_ref[...], preferred_element_type=jnp.float32) + b2_ref[...]
    h = jnp.maximum(h, 0.0).astype(jnp.bfloat16)

    # Linear 3 (narrow action head) + final tanh in f32 (only action_dim lanes
    # -> EUP cost negligible; keeps output precision at f32).
    mu = jnp.dot(h, w3_ref[...], preferred_element_type=jnp.float32) + b3_ref[...]
    mu_ref[...] = jnp.tanh(mu).astype(mu_ref.dtype)


def prepare_actor_params(params):
    """One-time weight preparation (hoisted out of the per-call path).

    Casts the three weight matrices to bf16 for the MXU; biases / LayerNorm
    affine stay f32. Call once after init / param update, not per forward.
    """
    return dict(
        w1=params["w1"].astype(jnp.bfloat16),
        b1=params["b1"].astype(jnp.float32),
        ln_g=params["ln_g"].astype(jnp.float32),
        ln_b=params["ln_b"].astype(jnp.float32),
        w2=params["w2"].astype(jnp.bfloat16),
        b2=params["b2"].astype(jnp.float32),
        w3=params["w3"].astype(jnp.bfloat16),
        b3=params["b3"].astype(jnp.float32),
    )


def _choose_tiling(batch, tile_b_max):
    """Batch tiling with bounded (<8 rows/tile) padding."""
    padded8 = _round_up(max(batch, 8), 8)
    num_tiles = pl.cdiv(padded8, tile_b_max)
    # Once the batch is large enough that per-step pipeline overhead (~0.35us)
    # is negligible, keep >= 2 grid steps so both v7x TensorCores get work.
    if num_tiles == 1 and padded8 >= 1024:
        num_tiles = 2
    tile_b = _round_up(pl.cdiv(padded8, num_tiles), 8)
    return tile_b, tile_b * num_tiles, num_tiles


def actor_forward(obs, params, std_scalar, *, tile_b_max=1024):
    """Actor policy MLP forward as one gridded Pallas kernel.

    Returns (mu, std) — the parameters of utils.TruncatedNormal(mu, std).
    `params` should come from `prepare_actor_params` (bf16 weights), so there
    is zero per-call weight conversion.
    """
    batch, obs_dim = obs.shape
    hidden = params["w1"].shape[1]
    action_dim = params["w3"].shape[1]

    tile_b, padded_batch, num_tiles = _choose_tiling(batch, tile_b_max)
    if padded_batch != batch:
        obs = jnp.pad(obs, ((0, padded_batch - batch), (0, 0)))

    flops = 2 * padded_batch * (obs_dim * hidden + hidden * hidden
                                + hidden * action_dim)
    transcendentals = padded_batch * (hidden + action_dim + 1)
    bytes_accessed = (padded_batch * obs_dim * 4
                      + (params["w1"].size + params["w2"].size
                         + params["w3"].size) * 2
                      + (4 * hidden + action_dim) * 4
                      + padded_batch * action_dim * 4)

    resident = lambda i: (0, 0)   # weights / biases: DMA'd once, VMEM-resident
    tiled = lambda i: (i, 0)      # obs / mu: tiled along batch

    # NOTE: resident weight specs could use pipeline_mode=pl.Buffered(1) to
    # drop their double-buffer; at hidden=128 the VMEM saving is negligible.
    # TODO(synk): obs_dim=24 could be pre-padded to 32/128 at dataset-prep time
    # for fully aligned first-matmul loads (low priority, data-side change).
    mu = pl.pallas_call(
        functools.partial(_actor_kernel,
                          bf16_eup=_bf16_transcendentals_supported()),
        out_shape=jax.ShapeDtypeStruct((padded_batch, action_dim), jnp.float32),
        grid=(num_tiles,),
        in_specs=[
            pl.BlockSpec((tile_b, obs_dim), tiled),        # obs
            pl.BlockSpec((obs_dim, hidden), resident),     # w1 (bf16)
            pl.BlockSpec((1, hidden), resident),           # b1
            pl.BlockSpec((1, hidden), resident),           # ln gamma
            pl.BlockSpec((1, hidden), resident),           # ln beta
            pl.BlockSpec((hidden, hidden), resident),      # w2 (bf16)
            pl.BlockSpec((1, hidden), resident),           # b2
            pl.BlockSpec((hidden, action_dim), resident),  # w3 (bf16)
            pl.BlockSpec((1, action_dim), resident),       # b3
        ],
        out_specs=pl.BlockSpec((tile_b, action_dim), tiled),
        compiler_params=pltpu.CompilerParams(
            dimension_semantics=("parallel",)),
        cost_estimate=pl.CostEstimate(flops=flops,
                                      transcendentals=transcendentals,
                                      bytes_accessed=bytes_accessed),
    )(
        obs,
        params["w1"], params["b1"], params["ln_g"], params["ln_b"],
        params["w2"], params["b2"],
        params["w3"], params["b3"],
    )

    if padded_batch != batch:
        mu = mu[:batch]
    # std is a constant-filled tensor — no point burning kernel store bandwidth.
    std = jnp.full((batch, action_dim), std_scalar, dtype=mu.dtype)
    # TODO(synk): utils.TruncatedNormal is a sampling-time distribution object;
    # the kernel returns its (mu, std) parameters, which is the full forward compute.
    return mu, std


def init_actor_params(key, obs_dim, action_dim, hidden_dim):
    """Deterministic synthetic init (orthogonal-ish via scaled normal)."""
    ks = jax.random.split(key, 6)
    # weights stored as (in, out) == transpose of torch.nn.Linear.weight
    w1 = jax.random.normal(ks[0], (obs_dim, hidden_dim), jnp.float32) / jnp.sqrt(obs_dim)
    b1 = jnp.zeros((1, hidden_dim), jnp.float32)
    ln_g = jnp.ones((1, hidden_dim), jnp.float32)
    ln_b = jnp.zeros((1, hidden_dim), jnp.float32)
    w2 = jax.random.normal(ks[1], (hidden_dim, hidden_dim), jnp.float32) / jnp.sqrt(hidden_dim)
    b2 = jnp.zeros((1, hidden_dim), jnp.float32)
    w3 = jax.random.normal(ks[2], (hidden_dim, action_dim), jnp.float32) / jnp.sqrt(hidden_dim)
    b3 = jnp.zeros((1, action_dim), jnp.float32)
    return dict(w1=w1, b1=b1, ln_g=ln_g, ln_b=ln_b, w2=w2, b2=b2, w3=w3, b3=b3)


def actor_forward_ref(obs, params, std_scalar):
    """Pure-JAX f32 reference of the same forward pass (for validation)."""
    h = obs @ params["w1"] + params["b1"]
    mean = jnp.mean(h, axis=-1, keepdims=True)
    var = jnp.mean((h - mean) ** 2, axis=-1, keepdims=True)
    h = (h - mean) * jax.lax.rsqrt(var + LN_EPS) * params["ln_g"] + params["ln_b"]
    h = jnp.tanh(h)
    h = jnp.maximum(h @ params["w2"] + params["b2"], 0.0)
    mu = jnp.tanh(h @ params["w3"] + params["b3"])
    std = jnp.ones_like(mu) * std_scalar
    return mu, std


if __name__ == "__main__":
    # small shapes consistent with the module
    batch, obs_dim, action_dim, hidden_dim = 8, 24, 6, 128
    std_scalar = 0.2

    key = jax.random.PRNGKey(0)
    k_obs, k_par = jax.random.split(key)
    obs = jax.random.normal(k_obs, (batch, obs_dim), jnp.float32)
    params = init_actor_params(k_par, obs_dim, action_dim, hidden_dim)

    # One-time weight prep (hoisted out of the forward path).
    prepared = prepare_actor_params(params)

    mu, std = actor_forward(obs, prepared, std_scalar)
    jax.block_until_ready((mu, std))

    mu_ref, std_ref = actor_forward_ref(obs, params, std_scalar)
    assert mu.shape == (batch, action_dim) and std.shape == (batch, action_dim)
    # bf16 matmul operands (f32 accumulation) vs pure-f32 reference -> loosened tol;
    # LayerNorm / ReLU / final tanh remain f32 inside the kernel.
    assert jnp.allclose(mu, mu_ref, atol=3e-2, rtol=3e-2), float(jnp.max(jnp.abs(mu - mu_ref)))
    assert jnp.allclose(std, std_ref, atol=1e-6, rtol=1e-6)

    print("KERNEL_OK")
</pallas_src>

<mosaic_0001>
module attributes {stable_mosaic.version = 11 : i64} {
  func.func @_actor_kernel(%arg0: i32, %arg1: memref<8x24xf32, #tpu.memory_space<vmem>>, %arg2: memref<24x128xbf16, #tpu.memory_space<vmem>>, %arg3: memref<1x128xf32, #tpu.memory_space<vmem>>, %arg4: memref<1x128xf32, #tpu.memory_space<vmem>>, %arg5: memref<1x128xf32, #tpu.memory_space<vmem>>, %arg6: memref<128x128xbf16, #tpu.memory_space<vmem>>, %arg7: memref<1x128xf32, #tpu.memory_space<vmem>>, %arg8: memref<128x6xbf16, #tpu.memory_space<vmem>>, %arg9: memref<1x6xf32, #tpu.memory_space<vmem>>, %arg10: memref<8x6xf32, #tpu.memory_space<vmem>>) attributes {dimension_semantics = [#tpu.dimension_semantics<parallel>], iteration_bounds = array<i64: 1>, scalar_prefetch = 0 : i64, scratch_operands = 0 : i64, tpu.core_type = #tpu.core_type<tc>, window_params = [{transform_indices = @transform_0, window_bounds = array<i64: 8, 24>}, {pipeline_mode = #tpu.pipeline_mode<synchronous>, transform_indices = @transform_1, window_bounds = array<i64: 24, 128>}, {pipeline_mode = #tpu.pipeline_mode<synchronous>, transform_indices = @transform_2, window_bounds = array<i64: 1, 128>}, {pipeline_mode = #tpu.pipeline_mode<synchronous>, transform_indices = @transform_3, window_bounds = array<i64: 1, 128>}, {pipeline_mode = #tpu.pipeline_mode<synchronous>, transform_indices = @transform_4, window_bounds = array<i64: 1, 128>}, {pipeline_mode = #tpu.pipeline_mode<synchronous>, transform_indices = @transform_5, window_bounds = array<i64: 128, 128>}, {pipeline_mode = #tpu.pipeline_mode<synchronous>, transform_indices = @transform_6, window_bounds = array<i64: 1, 128>}, {pipeline_mode = #tpu.pipeline_mode<synchronous>, transform_indices = @transform_7, window_bounds = array<i64: 128, 6>}, {pipeline_mode = #tpu.pipeline_mode<synchronous>, transform_indices = @transform_8, window_bounds = array<i64: 1, 6>}, {transform_indices = @transform_9, window_bounds = array<i64: 8, 6>}]} {
    %c0 = arith.constant 0 : index
    %c0_0 = arith.constant 0 : index
    %0 = vector.load %arg1[%c0, %c0_0] : memref<8x24xf32, #tpu.memory_space<vmem>>, vector<8x24xf32>
    %1 = arith.truncf %0 : vector<8x24xf32> to vector<8x24xbf16>
    %c0_1 = arith.constant 0 : index
    %c0_2 = arith.constant 0 : index
    %2 = vector.load %arg2[%c0_1, %c0_2] : memref<24x128xbf16, #tpu.memory_space<vmem>>, vector<24x128xbf16>
    %cst = arith.constant dense<0.000000e+00> : vector<8x128xf32>
    %3 = tpu.matmul %1, %2, %cst {dimension_numbers = #tpu.dot_dimension_numbers<[1], [0], [0], [1], [0, 0, 1, 1], [], []>} : vector<8x24xbf16>, vector<24x128xbf16>, vector<8x128xf32> -> vector<8x128xf32>
    %c0_3 = arith.constant 0 : index
    %c0_4 = arith.constant 0 : index
    %4 = vector.load %arg3[%c0_3, %c0_4] : memref<1x128xf32, #tpu.memory_space<vmem>>, vector<1x128xf32>
    %5 = vector.broadcast %4 : vector<1x128xf32> to vector<8x128xf32>
    %6 = arith.addf %3, %5 : vector<8x128xf32>
    %cst_5 = arith.constant dense<0.000000e+00> : vector<8xf32>
    %7 = vector.multi_reduction <add>, %6, %cst_5 [1] : vector<8x128xf32> to vector<8xf32>
    %8 = vector.shape_cast %7 : vector<8xf32> to vector<8x1xf32>
    %cst_6 = arith.constant 1.280000e+02 : f32
    %9 = vector.broadcast %cst_6 : f32 to vector<8x1xf32>
    %10 = arith.divf %8, %9 : vector<8x1xf32>
    %11 = arith.mulf %6, %6 : vector<8x128xf32>
    %cst_7 = arith.constant dense<0.000000e+00> : vector<8xf32>
    %12 = vector.multi_reduction <add>, %11, %cst_7 [1] : vector<8x128xf32> to vector<8xf32>
    %13 = vector.shape_cast %12 : vector<8xf32> to vector<8x1xf32>
    %cst_8 = arith.constant 1.280000e+02 : f32
    %14 = vector.broadcast %cst_8 : f32 to vector<8x1xf32>
    %15 = arith.divf %13, %14 : vector<8x1xf32>
    %16 = arith.mulf %10, %10 : vector<8x1xf32>
    %17 = arith.subf %15, %16 : vector<8x1xf32>
    %cst_9 = arith.constant 0.000000e+00 : f32
    %18 = vector.broadcast %cst_9 : f32 to vector<8x1xf32>
    %19 = arith.maximumf %17, %18 : vector<8x1xf32>
    %20 = vector.broadcast %10 : vector<8x1xf32> to vector<8x128xf32>
    %21 = arith.subf %6, %20 : vector<8x128xf32>
    %cst_10 = arith.constant 9.99999974E-6 : f32
    %22 = vector.broadcast %cst_10 : f32 to vector<8x1xf32>
    %23 = arith.addf %19, %22 : vector<8x1xf32>
    %24 = math.rsqrt %23 : vector<8x1xf32>
    %25 = vector.broadcast %24 : vector<8x1xf32> to vector<8x128xf32>
    %26 = arith.mulf %21, %25 : vector<8x128xf32>
    %c0_11 = arith.constant 0 : index
    %c0_12 = arith.constant 0 : index
    %27 = vector.load %arg4[%c0_11, %c0_12] : memref<1x128xf32, #tpu.memory_space<vmem>>, vector<1x128xf32>
    %28 = vector.broadcast %27 : vector<1x128xf32> to vector<8x128xf32>
    %29 = arith.mulf %26, %28 : vector<8x128xf32>
    %c0_13 = arith.constant 0 : index
    %c0_14 = arith.constant 0 : index
    %30 = vector.load %arg5[%c0_13, %c0_14] : memref<1x128xf32, #tpu.memory_space<vmem>>, vector<1x128xf32>
    %31 = vector.broadcast %30 : vector<1x128xf32> to vector<8x128xf32>
    %32 = arith.addf %29, %31 : vector<8x128xf32>
    %33 = arith.truncf %32 : vector<8x128xf32> to vector<8x128xbf16>
    %34 = math.tanh %33 : vector<8x128xbf16>
    %c0_15 = arith.constant 0 : index
    %c0_16 = arith.constant 0 : index
    %35 = vector.load %arg6[%c0_15, %c0_16] : memref<128x128xbf16, #tpu.memory_space<vmem>>, vector<128x128xbf16>
    %cst_17 = arith.constant dense<0.000000e+00> : vector<8x128xf32>
    %36 = tpu.matmul %34, %35, %cst_17 {dimension_numbers = #tpu.dot_dimension_numbers<[1], [0], [0], [1], [0, 0, 1, 1], [], []>} : vector<8x128xbf16>, vector<128x128xbf16>, vector<8x128xf32> -> vector<8x128xf32>
    %c0_18 = arith.constant 0 : index
    %c0_19 = arith.constant 0 : index
    %37 = vector.load %arg7[%c0_18, %c0_19] : memref<1x128xf32, #tpu.memory_space<vmem>>, vector<1x128xf32>
    %38 = vector.broadcast %37 : vector<1x128xf32> to vector<8x128xf32>
    %39 = arith.addf %36, %38 : vector<8x128xf32>
    %cst_20 = arith.constant 0.000000e+00 : f32
    %40 = vector.broadcast %cst_20 : f32 to vector<8x128xf32>
    %41 = arith.maximumf %39, %40 : vector<8x128xf32>
    %42 = arith.truncf %41 : vector<8x128xf32> to vector<8x128xbf16>
    %c0_21 = arith.constant 0 : index
    %c0_22 = arith.constant 0 : index
    %43 = vector.load %arg8[%c0_21, %c0_22] : memref<128x6xbf16, #tpu.memory_space<vmem>>, vector<128x6xbf16>
    %cst_23 = arith.constant dense<0.000000e+00> : vector<8x6xf32>
    %44 = tpu.matmul %42, %43, %cst_23 {dimension_numbers = #tpu.dot_dimension_numbers<[1], [0], [0], [1], [0, 0, 1, 1], [], []>} : vector<8x128xbf16>, vector<128x6xbf16>, vector<8x6xf32> -> vector<8x6xf32>
    %c0_24 = arith.constant 0 : index
    %c0_25 = arith.constant 0 : index
    %45 = vector.load %arg9[%c0_24, %c0_25] : memref<1x6xf32, #tpu.memory_space<vmem>>, vector<1x6xf32>
    %46 = vector.broadcast %45 : vector<1x6xf32> to vector<8x6xf32>
    %47 = arith.addf %44, %46 : vector<8x6xf32>
    %48 = math.tanh %47 : vector<8x6xf32>
    %c0_26 = arith.constant 0 : index
    %c0_27 = arith.constant 0 : index
    %49 = vector.load %arg10[%c0_26, %c0_27] : memref<8x6xf32, #tpu.memory_space<vmem>>, vector<8x6xf32>
    tpu.vector_store %arg10[%c0_26, %c0_27], %48 {strides = array<i32>} : memref<8x6xf32, #tpu.memory_space<vmem>>, vector<8x6xf32>,
    return
  }
  func.func @transform_0(%arg0: i32) -> (i32, i32) {
    %c0_i32 = arith.constant 0 : i32
    %c0_i32_0 = arith.constant 0 : i32
    return %arg0, %c0_i32 : i32, i32
  }
  func.func @transform_1(%arg0: i32) -> (i32, i32) {
    %c0_i32 = arith.constant 0 : i32
    %c0_i32_0 = arith.constant 0 : i32
    %c0_i32_1 = arith.constant 0 : i32
    return %c0_i32, %c0_i32_0 : i32, i32
  }
  func.func @transform_2(%arg0: i32) -> (i32, i32) {
    %c0_i32 = arith.constant 0 : i32
    %c0_i32_0 = arith.constant 0 : i32
    %c0_i32_1 = arith.constant 0 : i32
    return %c0_i32, %c0_i32_0 : i32, i32
  }
  func.func @transform_3(%arg0: i32) -> (i32, i32) {
    %c0_i32 = arith.constant 0 : i32
    %c0_i32_0 = arith.constant 0 : i32
    %c0_i32_1 = arith.constant 0 : i32
    return %c0_i32, %c0_i32_0 : i32, i32
  }
  func.func @transform_4(%arg0: i32) -> (i32, i32) {
    %c0_i32 = arith.constant 0 : i32
    %c0_i32_0 = arith.constant 0 : i32
    %c0_i32_1 = arith.constant 0 : i32
    return %c0_i32, %c0_i32_0 : i32, i32
  }
  func.func @transform_5(%arg0: i32) -> (i32, i32) {
    %c0_i32 = arith.constant 0 : i32
    %c0_i32_0 = arith.constant 0 : i32
    %c0_i32_1 = arith.constant 0 : i32
    return %c0_i32, %c0_i32_0 : i32, i32
  }
  func.func @transform_6(%arg0: i32) -> (i32, i32) {
    %c0_i32 = arith.constant 0 : i32
    %c0_i32_0 = arith.constant 0 : i32
    %c0_i32_1 = arith.constant 0 : i32
    return %c0_i32, %c0_i32_0 : i32, i32
  }
  func.func @transform_7(%arg0: i32) -> (i32, i32) {
    %c0_i32 = arith.constant 0 : i32
    %c0_i32_0 = arith.constant 0 : i32
    %c0_i32_1 = arith.constant 0 : i32
    return %c0_i32, %c0_i32_0 : i32, i32
  }
  func.func @transform_8(%arg0: i32) -> (i32, i32) {
    %c0_i32 = arith.constant 0 : i32
    %c0_i32_0 = arith.constant 0 : i32
    %c0_i32_1 = arith.constant 0 : i32
    return %c0_i32, %c0_i32_0 : i32, i32
  }
  func.func @transform_9(%arg0: i32) -> (i32, i32) {
    %c0_i32 = arith.constant 0 : i32
    %c0_i32_0 = arith.constant 0 : i32
    return %arg0, %c0_i32 : i32, i32
  }
}

</mosaic_0001>

<bundles_post_ra>
// kernel: tpu_custom_call.1
= control target key start
LH: loop header
LB: loop body
LE: loop exit
PB: predicated region body
PF: predicated region fallthrough
CT: control target
= control target key end

     0   :  { %14 = vsyncpa [#allocation3], 0  ;;  %s778_s0 = inlined_call_operand.vmem [shape: f32[8,24], index: 0, kind: input, shape index: {}]   ;;  %s779_s1 = inlined_call_operand.vmem [shape: bf16[24,128], index: 1, kind: input, shape index: {}]   ;;  %s780_s2 = inlined_call_operand.vmem [shape: f32[1,128], index: 2, kind: input, shape index: {}]   ;;  %s781_s3 = inlined_call_operand.vmem [shape: f32[1,128], index: 3, kind: input, shape index: {}]   ;;  %s782_s4 = inlined_call_operand.hbm [shape: f32[1,128], index: 4, kind: input, shape index: {}]   ;;  %s783_s5 = inlined_call_operand.vmem [shape: bf16[128,128], index: 5, kind: input, shape index: {}]   ;;  %s784_s6 = inlined_call_operand.hbm [shape: f32[1,128], index: 6, kind: input, shape index: {}]   ;;  %s785_s7 = inlined_call_operand.vmem [shape: bf16[128,6], index: 7, kind: input, shape index: {}]   ;;  %s786_s8 = inlined_call_operand.vmem [shape: f32[1,6], index: 8, kind: input, shape index: {}]   ;;  %s787_s9 = inlined_call_operand.hbm [shape: f32[8,6], index: 9, kind: output, shape index: {}]  }
   0x1   :  { %15 = vsyncpa [#allocation6], 0 }
   0x2   :  { %16 = vsyncpa [#allocation4], 0  ;;  %s597_s30 = smov [#allocation2]   ;;  %s598_s11 = smov [#allocation5]  }
   0x3   :  { %s31_s10 = sshll.u32 %s597_s30, 4  ;;  %s43_s12 = sshll.u32 %s598_s11, 4  ;;  %s32_s10 = int_to_ptr.vmem [resolvable:$true] %s31_s10  ;;  %s44_s12 = int_to_ptr.vmem [resolvable:$true] %s43_s12 }
   0x4   :  { %s525_s15 = scalar_lea.hbm %s782_s4, 16 }
   0x5   :  { %p526_p0 = scmp.ne.s32.totalorder %s782_s4, %s525_s15  ;;  %p529_p1 = scmp.lt.u32.totalorder %s525_s15, %s782_s4 }
   0x7   :  { %p531_p2 = pnand %p529_p1, %p526_p0 }
   0x9   :  { %534 = shalt.err (!%p531_p2)
}
   0xa   :  { %s535_s20 = scalar_lea.vmem %s32_s10, 16  ;;  %s539_s21 = scalar_lea.vmem %s32_s10, 32 }
   0xb   :  { %p536_p3 = scmp.ne.s32.totalorder %s32_s10, %s535_s20  ;;  %p540_p4 = scmp.lt.s32.totalorder %s32_s10, %s32_s10 }
   0xc   :  { %p541_p5 = scmp.lt.s32.totalorder %s539_s21, %s535_s20 }
   0xe   :  { %p542_p6 = por %p541_p5, %p540_p4 }
  0x10   :  { %p543_p7 = pnand %p542_p6, %p536_p3 }
  0x12   :  { %546 = shalt.err (!%p543_p7)
}
  0x13   :  { %34 = dma.hbm_to_vmem [thread:$0]  %s782_s4, 16, %s32_s10, [#allocation3]  }
  0x14   :  { %s547_s26 = scalar_lea.hbm %s784_s6, 16 }
  0x15   :  { %p548_p8 = scmp.ne.s32.totalorder %s784_s6, %s547_s26  ;;  %p551_p9 = scmp.lt.u32.totalorder %s547_s26, %s784_s6 }
  0x17   :  { %p553_p10 = pnand %p551_p9, %p548_p8 }
  0x19   :  { %556 = shalt.err (!%p553_p10)
}
  0x1a   :  { %s557_s11 = scalar_lea.vmem %s44_s12, 16  ;;  %s561_s13 = scalar_lea.vmem %s44_s12, 32 }
  0x1b   :  { %p558_p11 = scmp.ne.s32.totalorder %s44_s12, %s557_s11  ;;  %p562_p12 = scmp.lt.s32.totalorder %s44_s12, %s44_s12 }
  0x1c   :  { %p563_p13 = scmp.lt.s32.totalorder %s561_s13, %s557_s11 }
  0x1e   :  { %p564_p0 = por %p563_p13, %p562_p12 }
  0x20   :  { %p565_p1 = pnand %p564_p0, %p558_p11 }
  0x22   :  { %568 = shalt.err (!%p565_p1)
}
  0x23   :  { %46 = dma.hbm_to_vmem [thread:$0]  %s784_s6, 16, %s44_s12, [#allocation6]  }
  0x24   :  { %591 = dma.done.wait [#allocation3], 16  }
  0x25   :  { %592 = vsyncadd [#allocation3], 4294967280 }
  0x26   :  { %593 = dma.done.wait [#allocation6], 16  }
  0x27   :  { %594 = vsyncadd [#allocation6], 4294967280  ;;  %v599_v0 = vmov 0.0   ;;  %vm600_vm0 = vmmov 0   ;;  %v501_v1 = vld [vmem:[%s779_s1] sm:$0xff]   ;;  %vm83_vm1 = vcmask 1043456  }
  0x28   :  { %448 = vmatprep.subr.bf16.mxu0 %v599_v0  ;;  %452 = vmatprep.mubr.msk.bf16.mxu0 %vm600_vm0, %v599_v0  ;;  %v502_v2 = vld [vmem:[%s779_s1 + $0x8] ss:$0 sps:$4 sm:$0xff]   ;;  %v58_v3 = vld [vmem:[%s778_s0] sm:$0xff]  ;;  %vm79_vm2 = vcmask 195584   ;;  %v505_v15 = vld [vmem:[%s783_s5 + $0x10] sm:$0xff]   ;;  %vm385_vm3 = vcmask 48128  }
  0x29   :  { %456 = vmatprep.subr.bf16.mxu1 %v599_v0  ;;  %472 = vmatprep.mubr.msk.bf16.mxu1 %vm600_vm0, %v599_v0  ;;  %v85_v4 = vsel %vm83_vm1, %v502_v2, 0  ;;  %v59_v5 = vpack.c.bf16 %v58_v3, %v58_v3  ;;  %v403_v6 = vld [vmem:[%s780_s2] ss:$0 sm:$0xff]  ;;  %v504_v14 = vld [vmem:[%s783_s5 + $0x8] sm:$0xff]   ;;  %v506_v16 = vld [vmem:[%s783_s5 + $0x18] sm:$0xff]  }
  0x2a   :  { %449 = vmatpush3.bf16.msra.mxu0 %v501_v1  ;;  %v503_v13 = vld [vmem:[%s783_s5] sm:$0xff]   ;;  %v508_v18 = vld [vmem:[%s783_s5 + $0x28] sm:$0xff]   ;;  %v509_v19 = vld [vmem:[%s783_s5 + $0x30] sm:$0xff]  }
  0x2b   :  { %450 = vmatprep.subr.bf16.mxu0 %v599_v0  ;;  %457 = vmatpush3.bf16.msra.mxu1 %v503_v13  ;;  %v507_v17 = vld [vmem:[%s783_s5 + $0x20] sm:$0xff]   ;;  %v510_v20 = vld [vmem:[%s783_s5 + $0x38] sm:$0xff]   ;;  %v512_v22 = vld [vmem:[%s785_s7 + $0x8] sm:$0xff]  }
  0x2c   :  { %458 = vmatprep.subr.bf16.mxu1 %v599_v0  ;;  %v511_v21 = vld [vmem:[%s785_s7] sm:$0xff]   ;;  %v513_v23 = vld [vmem:[%s785_s7 + $0x10] sm:$0xff]   ;;  %v514_v24 = vld [vmem:[%s785_s7 + $0x18] sm:$0xff]  }
  0x2d   :  { %v515_v25 = vld [vmem:[%s785_s7 + $0x20] sm:$0xff]   ;;  %v516_v26 = vld [vmem:[%s785_s7 + $0x28] sm:$0xff]   ;;  %v517_v44 = vld [vmem:[%s785_s7 + $0x30] sm:$0xff]  }
  0x2e   :  { %451 = vmatpush3.bf16.msra.mxu0 %v85_v4  ;;  %v407_v37 = vld [vmem:[%s781_s3] ss:$0 sm:$0xff]  ;;  %v518_v45 = vld [vmem:[%s785_s7 + $0x38] sm:$0xff]   ;;  %v409_v46 = vld [vmem:[#allocation5] ss:$0 sm:$0xff]  ;;  %s601_s7 = smov [#allocation7]  }
  0x2f   :  { %476 = vmatprep.subr.bf16.mxu0 %v599_v0  ;;  %459 = vmatpush3.bf16.msra.mxu1 %v504_v14  ;;  %v408_v39 = vld [vmem:[#allocation2] ss:$0 sm:$0xff]  ;;  %s393_s25 = sshll.u32 %s601_s7, 4  ;;  %s394_s25 = int_to_ptr.vmem [resolvable:$true] %s393_s25 }
  0x30   :  { %460 = vmatprep.subr.bf16.mxu1 %v599_v0  ;;  %v418_v54 = vld [vmem:[%s786_s8] ss:$0 sm:$0xff]  ;;  %s569_s26 = scalar_lea.vmem %s394_s25, 128  ;;  %p574_p3 = scmp.lt.s32.totalorder %s394_s25, %s394_s25 }
  0x31   :  { %453 = vmatmul.mubr.msk.bf16.vlgmr.msra.gmra.mrb[0].mxu0 %vm79_vm2, %v59_v5  ;;  %p570_p2 = scmp.ne.s32.totalorder %s394_s25, %s569_s26  ;;  %p575_p4 = scmp.lt.s32.totalorder %s569_s26, %s569_s26 }
  0x32   :  { %492 = vmatprep.mubr.msk.bf16.mxu0 %vm600_vm0, %v599_v0  ;;  %477 = vmatpush3.bf16.msra.mxu0 %v511_v21 }
  0x33   :  { %461 = vmatpush3.bf16.msra.mxu1 %v505_v15  ;;  %478 = vmatprep.subr.bf16.mxu0 %v599_v0  ;;  %p576_p5 = por %p575_p4, %p574_p3 }
  0x34   :  { %462 = vmatprep.subr.bf16.mxu1 %v599_v0 }
  0x35   :  { %p577_p6 = pnand %p576_p5, %p570_p2 }
  0x36   :  { %479 = vmatpush3.bf16.msra.mxu0 %v512_v22 }
  0x37   :  { %463 = vmatpush3.bf16.msra.mxu1 %v506_v16  ;;  %480 = vmatprep.subr.bf16.mxu0 %v599_v0 }
  0x38   :  { %464 = vmatprep.subr.bf16.mxu1 %v599_v0 }
  0x3a   :  { %481 = vmatpush3.bf16.msra.mxu0 %v513_v23 }
  0x3b   :  { %465 = vmatpush3.bf16.msra.mxu1 %v507_v17  ;;  %482 = vmatprep.subr.bf16.mxu0 %v599_v0 }
  0x3c   :  { %466 = vmatprep.subr.bf16.mxu1 %v599_v0 }
  0x3e   :  { %483 = vmatpush3.bf16.msra.mxu0 %v514_v24 }
  0x3f   :  { %467 = vmatpush3.bf16.msra.mxu1 %v508_v18  ;;  %484 = vmatprep.subr.bf16.mxu0 %v599_v0 }
  0x40   :  { %468 = vmatprep.subr.bf16.mxu1 %v599_v0 }
  0x42   :  { %485 = vmatpush3.bf16.msra.mxu0 %v515_v25 }
  0x43   :  { %469 = vmatpush3.bf16.msra.mxu1 %v509_v19  ;;  %486 = vmatprep.subr.bf16.mxu0 %v599_v0 }
  0x44   :  { %470 = vmatprep.subr.bf16.mxu1 %v599_v0 }
  0x46   :  { %487 = vmatpush3.bf16.msra.mxu0 %v516_v26 }
  0x47   :  { %471 = vmatpush3.bf16.msra.mxu1 %v510_v20  ;;  %488 = vmatprep.subr.bf16.mxu0 %v599_v0 }
  0x4a   :  { %489 = vmatpush3.bf16.msra.mxu0 %v517_v44 }
  0x4b   :  { %490 = vmatprep.subr.bf16.mxu0 %v599_v0 }
  0x4e   :  { %491 = vmatpush3.bf16.msra.mxu0 %v518_v45 }
 0x104   :  { %v121_v7 = vpop.f32.mrb[0].mxu0 }
 0x105   :  { %v122_v8 = vadd.f32 %v403_v6, %v121_v7  ;;  %v454_v9 = vpop.f32.mrb[1].mxu0 }
 0x106   :  { %v124_v10 = vpop.f32.mrb[2].mxu0 }
 0x107   :  { %127 = vadd.xlane.f32.xlu0 %v122_v8  ;;  %v455_v11 = vpop.f32.mrb[3].mxu0  ;;  %v131_v12 = vmul.f32 %v122_v8, %v122_v8 }
 0x10b   :  { %132 = vadd.xlane.f32.xlu0 %v131_v12 }
 0x194   :  { %v128_v27 = vpop.xlane.xlu0 %127 }
 0x195   :  { %v130_v28 = vmul.f32 0.0078125, %v128_v27 }
 0x197   :  { %v135_v30 = vmul.f32 %v130_v28, %v130_v28  ;;  %v138_v35 = vsub.f32 %v122_v8, %v130_v28 }
 0x198   :  { %v133_v29 = vpop.xlane.xlu0 %132 }
 0x199   :  { %v134_v31 = vmul.f32 0.0078125, %v133_v29 }
 0x19b   :  { %v136_v32 = vsub.f32 %v134_v31, %v135_v30 }
 0x19d   :  { %v137_v33 = vmax.f32 %v136_v32, 0.0 }
 0x19f   :  { %v139_v34 = vadd.f32 1e-05, %v137_v33 }
 0x1a1   :  { %519 = vrsqrt.f32 %v139_v34 }
 0x1ab   :  { %v520_v36 = vpop.eup %519 }
 0x1ac   :  { %v141_v38 = vmul.f32 %v520_v36, %v138_v35 }
 0x1ae   :  { %v149_v40 = vmul.f32 %v407_v37, %v141_v38 }
 0x1b0   :  { %v157_v41 = vadd.f32 %v408_v39, %v149_v40 }
 0x1b2   :  { %v158_v42 = vpack.c.bf16 %v157_v41, %v157_v41 }
 0x1b4   :  { %521 = vtanh.bf16 %v158_v42 }
 0x1bf   :  { %v522_v43 = vpop.eup %521 }
 0x1c0   :  { %473 = vmatmul.mubr.bf16.vlgmr.msra.gmra.mrb[0].mxu1 %v522_v43 }
 0x293   :  { %v265_v47 = vpop.f32.mrb[0].mxu1 }
 0x294   :  { %v266_v48 = vadd.f32 %v409_v46, %v265_v47  ;;  %v474_v49 = vpop.f32.mrb[1].mxu1 }
 0x295   :  { %v268_v50 = vpop.f32.mrb[2].mxu1 }
 0x296   :  { %v271_v51 = vmax.f32 %v266_v48, 0.0  ;;  %v475_v52 = vpop.f32.mrb[3].mxu1 }
 0x298   :  { %v272_v53 = vpack.c.bf16 %v271_v51, %v271_v51 }
 0x29a   :  { %493 = vmatmul.mubr.bf16.vlgmr.msra.gmra.mrb[4].mxu0 %v272_v53 }
 0x36d   :  { %v378_v55 = vpop.f32.mrb[4].mxu0 }
 0x36e   :  { %v379_v56 = vadd.f32 %v418_v54, %v378_v55  ;;  %v494_v57 = vpop.f32.mrb[5].mxu0 }
 0x36f   :  { %v381_v58 = vpop.f32.mrb[6].mxu0 }
 0x370   :  { %523 = vtanh.f32 %v379_v56  ;;  %v495_v59 = vpop.f32.mrb[7].mxu0 }
 0x37a   :  { %v524_v60 = vpop.eup %523 }
 0x37b   :  { %386 = vst.msk [vmem:[#allocation7] sm:$0xff] %vm385_vm3, %v524_v60 }
 0x37c   :  { %580 = shalt.err (!%p577_p6)
}
 0x37d   :  { %s581_s28 = scalar_lea.hbm %s787_s9, 128 }
 0x37e   :  { %p582_p7 = scmp.ne.s32.totalorder %s787_s9, %s581_s28  ;;  %p585_p8 = scmp.lt.u32.totalorder %s581_s28, %s787_s9 }
 0x380   :  { %p587_p9 = pnand %p585_p8, %p582_p7 }
 0x382   :  { %590 = shalt.err (!%p587_p9)
}
 0x383   :  { %396 = dma.vmem_to_hbm [thread:$0]  %s394_s25, 128, %s787_s9, [#allocation4]  }
 0x384   :  { %595 = dma.done.wait [#allocation4], 128  }
 0x385   :  { %596 = vsyncadd [#allocation4], 4294967168 }
 0x386   :  { %400 = vsyncpa [#allocation3], 1 }
 0x387   :  { %401 = vsyncpa [#allocation6], 1 }
 0x388   :  { %402 = vsyncpa [#allocation4], 1 }

</bundles_post_ra>
